<compile_context>
chip_gen: v7x
topology: tpu7x:2x2x1
jax: 0.10.0
libtpu: 0.0.40
codegen_flags: <defaults>
</compile_context>

<pallas_src>
import numpy as np
import jax
import jax.numpy as jnp
from jax.experimental import pallas as pl
from jax.experimental.pallas import tpu as pltpu


def make_sinusoid_table(n_position: int, d_hid: int) -> jnp.ndarray:
    """Reproduces PositionalEncoding._get_sinusoid_encoding_table exactly."""
    pos = np.arange(n_position, dtype=np.float64)[:, None]            # [P, 1]
    hid = np.arange(d_hid, dtype=np.int64)[None, :]                   # [1, D]
    angle = pos / np.power(10000.0, 2.0 * (hid // 2).astype(np.float64) / d_hid)
    table = np.empty_like(angle)
    table[:, 0::2] = np.sin(angle[:, 0::2])
    table[:, 1::2] = np.cos(angle[:, 1::2])
    return jnp.asarray(table, dtype=jnp.float32)                      # [P, D]


def _pos_enc_kernel(x_ref, pos_ref, o_ref):
    # x_ref/o_ref: (TB, TC) or (TB, TL, D); pos_ref has a leading size-1 axis
    # -> sublane broadcast handled by the VPU, no explicit tiling needed.
    o_ref[...] = x_ref[...] + pos_ref[...]


def _largest_divisor_tile(total: int, quantum: int, target: int) -> int:
    """Largest multiple of `quantum` dividing `total`, <= target (>= quantum).

    Falls back to `total` (full-dim block, always legal) when `total` is not a
    multiple of `quantum`.  Guarantees (8,128)-legal blocks with no remainder.
    """
    if total % quantum == 0:
        best = quantum
        cand = quantum
        while cand <= target:
            if total % cand == 0:
                best = cand
            cand += quantum
        return best
    return total


@jax.jit
def positional_encoding(x: jnp.ndarray, pos_table: jnp.ndarray) -> jnp.ndarray:
    """x: [B, L, D]; pos_table: [n_position, D] with n_position >= L."""
    B, L, D = x.shape
    cols = L * D
    itemsize = jnp.dtype(x.dtype).itemsize
    cparams = pltpu.CompilerParams(
        dimension_semantics=("parallel", "parallel"),
        vmem_limit_bytes=48 * 1024 * 1024,
    )
    cost = pl.CostEstimate(
        flops=B * cols,
        transcendentals=0,
        bytes_accessed=2 * B * cols * itemsize + cols * itemsize,
    )

    if cols % 128 == 0:
        # ---- lane-dense fast path: [B, L*D] with full-width vector stores ----
        x2 = x.reshape(B, cols)
        pos2 = pos_table[:L, :].reshape(1, cols).astype(x.dtype)

        tb = _largest_divisor_tile(B, 8, 256)                    # sublane tile
        col_target = max(512, (2 * 1024 * 1024) // (itemsize * tb))
        tc = _largest_divisor_tile(cols, 128, col_target)        # lane tile

        out2 = pl.pallas_call(
            _pos_enc_kernel,
            out_shape=jax.ShapeDtypeStruct((B, cols), x.dtype),
            grid_spec=pltpu.PrefetchScalarGridSpec(
                num_scalar_prefetch=0,
                grid=(cols // tc, B // tb),      # col outer -> pos tile reused
                in_specs=[
                    pl.BlockSpec((tb, tc), lambda jc, ib: (ib, jc)),   # x
                    pl.BlockSpec((1, tc), lambda jc, ib: (0, jc)),     # pos row
                ],
                out_specs=pl.BlockSpec((tb, tc), lambda jc, ib: (ib, jc)),
            ),
            input_output_aliases={0: 0},         # in-place add, no extra HBM out
            cost_estimate=cost,
            compiler_params=cparams,
        )(x2, pos2)
        return out2.reshape(B, L, D)

    # ---- general fallback: keep [B, L, D], full-D last dim ----
    pos3 = pos_table[:L, :].astype(x.dtype).reshape(1, L, D)

    tb = _largest_divisor_tile(B, 8, 64)
    row_target = max(8, (2 * 1024 * 1024) // (itemsize * tb * D))
    tl = _largest_divisor_tile(L, 8, row_target)

    out = pl.pallas_call(
        _pos_enc_kernel,
        out_shape=jax.ShapeDtypeStruct((B, L, D), x.dtype),
        grid_spec=pltpu.PrefetchScalarGridSpec(
            num_scalar_prefetch=0,
            grid=(L // tl, B // tb),
            in_specs=[
                pl.BlockSpec((tb, tl, D), lambda jl, ib: (ib, jl, 0)),   # x
                pl.BlockSpec((1, tl, D), lambda jl, ib: (0, jl, 0)),     # pos
            ],
            out_specs=pl.BlockSpec((tb, tl, D), lambda jl, ib: (ib, jl, 0)),
        ),
        input_output_aliases={0: 0},
        cost_estimate=cost,
        compiler_params=cparams,
    )(x, pos3)
    return out


if __name__ == "__main__":
    # Small shapes consistent with the module: batch=2, seq=8, hidden=32.
    B, L, D = 2, 8, 32
    n_position = 200

    key = jax.random.PRNGKey(0)
    x = jax.random.normal(key, (B, L, D), dtype=jnp.float32)

    pos_table = make_sinusoid_table(n_position, D)   # buffer, [200, 32]

    # Reference mirroring the PyTorch forward.
    ref = x + pos_table[None, :L, :]

    out = positional_encoding(x, pos_table)
    out = jax.block_until_ready(out)

    np.testing.assert_allclose(np.asarray(out), np.asarray(ref), rtol=1e-6, atol=1e-6)

    print("KERNEL_OK")
</pallas_src>

<mosaic_0001>
module attributes {stable_mosaic.version = 11 : i64} {
  func.func @_pos_enc_kernel(%arg0: i32, %arg1: i32, %arg2: memref<2x256xf32, #tpu.memory_space<vmem>>, %arg3: memref<1x256xf32, #tpu.memory_space<vmem>>, %arg4: memref<2x256xf32, #tpu.memory_space<vmem>>) attributes {dimension_semantics = [#tpu.dimension_semantics<parallel>, #tpu.dimension_semantics<parallel>], iteration_bounds = array<i64: 1, 1>, scalar_prefetch = 0 : i64, scratch_operands = 0 : i64, tpu.core_type = #tpu.core_type<tc>, window_params = [{transform_indices = @transform_0, window_bounds = array<i64: 2, 256>}, {transform_indices = @transform_1, window_bounds = array<i64: 1, 256>}, {transform_indices = @transform_2, window_bounds = array<i64: 2, 256>}]} {
    %c0 = arith.constant 0 : index
    %c0_0 = arith.constant 0 : index
    %0 = vector.load %arg2[%c0, %c0_0] : memref<2x256xf32, #tpu.memory_space<vmem>>, vector<2x256xf32>
    %c0_1 = arith.constant 0 : index
    %c0_2 = arith.constant 0 : index
    %1 = vector.load %arg3[%c0_1, %c0_2] : memref<1x256xf32, #tpu.memory_space<vmem>>, vector<1x256xf32>
    %2 = vector.broadcast %1 : vector<1x256xf32> to vector<2x256xf32>
    %3 = arith.addf %0, %2 : vector<2x256xf32>
    %c0_3 = arith.constant 0 : index
    %c0_4 = arith.constant 0 : index
    %4 = vector.load %arg4[%c0_3, %c0_4] : memref<2x256xf32, #tpu.memory_space<vmem>>, vector<2x256xf32>
    tpu.vector_store %arg4[%c0_3, %c0_4], %3 {strides = array<i32>} : memref<2x256xf32, #tpu.memory_space<vmem>>, vector<2x256xf32>,
    return
  }
  func.func @transform_0(%arg0: i32, %arg1: i32) -> (i32, i32) {
    %c0_i32 = arith.constant 0 : i32
    return %arg1, %arg0 : i32, i32
  }
  func.func @transform_1(%arg0: i32, %arg1: i32) -> (i32, i32) {
    %c0_i32 = arith.constant 0 : i32
    %c0_i32_0 = arith.constant 0 : i32
    return %c0_i32, %arg0 : i32, i32
  }
  func.func @transform_2(%arg0: i32, %arg1: i32) -> (i32, i32) {
    %c0_i32 = arith.constant 0 : i32
    return %arg1, %arg0 : i32, i32
  }
}

</mosaic_0001>

<bundles_post_ra>
// kernel: positional_encoding.1
= control target key start
LH: loop header
LB: loop body
LE: loop exit
PB: predicated region body
PF: predicated region fallthrough
CT: control target
= control target key end

     0   :  { %v14_v0 = vlaneseq  ;;  %v38_v1 = vmov 1983009808   ;;  %s63_s1 = inlined_call_operand.vmem [shape: f32[1,256], index: 1, kind: input, shape index: {}]   ;;  %s64_s0 = inlined_call_operand.vmem [shape: f32[2,256], index: 0, kind: input, shape index: {}, may-alias: {0,2}]   ;;  %s65_s2 = inlined_call_operand.vmem [shape: f32[2,256], index: 2, kind: output, shape index: {}, may-alias: {0,2}]  }
   0x1   :  { %v24_v2 = vunpack.c.l.s4 %v38_v1  ;;  %v12_v4 = vld [vmem:[%s63_s1] sm:$0x3] }
   0x2   :  { %v15_v3 = vshrl.u32 %v14_v0, 7  ;;  %v11_v12 = vld [vmem:[%s64_s0] sm:$0xf] }
   0x3   :  { %v25_v5 = vunpack.c.0.s8 %v24_v2 }
   0x4   :  { %v16_v6 = vsub.s32 0, %v15_v3  ;;  %v20_v7 = vsub.s32 1, %v15_v3 }
   0x5   :  { %v28_v10 = vsub.s32 %v25_v5, %v15_v3 }
   0x6   :  { %v17_v8 = vrot.slane %v12_v4, %v16_v6  ;;  %v21_v9 = vrot.slane %v12_v4, %v20_v7 }
   0x8   :  { %v22_v11 = vcombine.low %v17_v8, %v21_v9 }
   0xa   :  { %v29_v13 = vrot.slane %v22_v11, %v28_v10 }
   0xc   :  { %v31_v14 = vadd.f32 %v29_v13, %v11_v12 }
   0xe   :  { %32 = vst [vmem:[%s65_s2] sm:$0xf] %v31_v14 }

</bundles_post_ra>
